<compile_context>
chip_gen: v6e
topology: v6e:2x2x1
jax: 0.10.0
libtpu: 0.0.40
codegen_flags: <defaults>
</compile_context>

<pallas_src>
import functools
import math

import jax
import jax.numpy as jnp
from jax.experimental import pallas as pl
from jax.experimental.pallas import tpu as pltpu


# --------------------------------------------------------------------------- #
# Generation-aware VMEM limits / budgets.
# --------------------------------------------------------------------------- #
def _vmem_limits():
    phys = 64 * 1024 * 1024                      # conservative fallback (v7x-sized)
    try:
        phys = int(pltpu.get_tpu_info().vmem_capacity_bytes)
    except Exception:
        pass
    limit = min(phys * 3 // 4, 100 * 1024 * 1024)    # 96 MiB on v5e/v6e, 48 MiB on v7x
    limit = max(limit, 32 * 1024 * 1024)
    budget = min(phys * 3 // 5, 80 * 1024 * 1024)    # feature double-buffer budget
    budget = max(budget, 20 * 1024 * 1024)
    return limit, budget


# --------------------------------------------------------------------------- #
# Hot kernel: streaming, masked sum of (packed) features over time.
# --------------------------------------------------------------------------- #
def _time_sum_kernel(feat_ref, sum_ref, *, tt, total_groups, blocks_per_split):
    """sum_ref (1, Bt, P) accumulates feat tiles (Bt, tt, P) over the time axis.

    The grid is (split, batch, time); each split owns its own accumulator and a
    disjoint range of time blocks.  The last (possibly partial or entirely
    out-of-range) block is masked so no wrapper-side padding/copy is needed.
    """
    t = pl.program_id(2)

    @pl.when(t == 0)
    def _():
        sum_ref[...] = jnp.zeros_like(sum_ref)

    g = pl.program_id(0) * blocks_per_split + t          # global time-block index
    valid = total_groups - g * tt                        # #valid rows in this block

    # Accumulate in f32 regardless of the streamed dtype (bf16 stays bf16 in
    # HBM/VMEM and only widens here).
    x = feat_ref[...].astype(jnp.float32)                # (Bt, tt, P)

    @pl.when(valid >= tt)                                 # full block: no mask cost
    def _():
        sum_ref[...] += x.sum(axis=1)[None]

    @pl.when(valid < tt)                                  # ragged tail / overshoot
    def _():
        row = jax.lax.broadcasted_iota(jnp.int32, x.shape, 1)
        sum_ref[...] += jnp.where(row < valid, x, 0.0).sum(axis=1)[None]


# --------------------------------------------------------------------------- #
# Cold kernel: fold partial sums + connector + classifier + cross-entropy.
# --------------------------------------------------------------------------- #
def _head_kernel(inv_t, k, sum_ref, wc_ref, bc_ref, wm_ref, bm_ref, yoh_ref,
                 logits_ref, loss_ref):
    u = wc_ref.shape[0]
    psum = sum_ref[...].sum(axis=0)                       # fold the split axis -> (B, P)
    total = psum[:, 0:u]                                  # fold k lane-packing phases
    for c in range(1, k):
        total = total + psum[:, c * u:(c + 1) * u]

    # Mean over the padded time axis (pad_sequence zeros included, as in the
    # original torch module); mean_t(x W + b) == mean_t(x) W + b.
    pooled = total * jnp.float32(inv_t)                                   # (B, U)
    hidden = jnp.dot(pooled, wc_ref[...],
                     preferred_element_type=jnp.float32) + bc_ref[...]    # (B, D)
    logits = jnp.dot(hidden, wm_ref[...],
                     preferred_element_type=jnp.float32) + bm_ref[...]    # (B, C)
    logits_ref[...] = logits

    # CrossEntropyLoss (mean reduction): mean_b(logsumexp(logits) - logits[label]).
    m = jnp.max(logits, axis=-1, keepdims=True)
    lse = m + jnp.log(jnp.sum(jnp.exp(logits - m), axis=-1, keepdims=True))
    tgt = jnp.sum(logits * yoh_ref[...], axis=-1, keepdims=True)
    loss_ref[...] = jnp.mean(lse - tgt, axis=(0, 1), keepdims=True)       # (1, 1)


# --------------------------------------------------------------------------- #
# Tile selection helpers.
# --------------------------------------------------------------------------- #
def _pick_batch_tile(b):
    # Two 8-aligned batch steps when the batch is big enough; otherwise keep
    # the whole batch per step (the split axis then feeds the second v7x core).
    if b >= 16 and b % 16 == 0:
        return b // 2
    return b


def _pick_time_tile_groups(bt, tp, p, itemsize, budget):
    """Largest aligned time tile (in packed frame-groups) fitting the budget.

    Accounts for lane padding (p rounded up to 128), the double-buffered input
    block, the resident f32 accumulator block, and dtype sublane alignment.
    """
    lane_p = -(-p // 128) * 128
    align = max(8, 32 // max(itemsize, 1))                # 8 f32 / 16 bf16 / 32 int8
    acc_bytes = 2 * (-(-max(bt, 8) // 8) * 8) * lane_p * 4
    per_group = 2 * bt * lane_p * itemsize                # double-buffered bytes / group
    avail = max(budget - acc_bytes, per_group * align)
    ttg = (avail // per_group) // align * align
    ttg = int(max(align, min(ttg, 2048)))
    if tp <= ttg:
        return tp                                         # whole time axis in one block
    return ttg


# --------------------------------------------------------------------------- #
# Wrapper (the DownstreamExpert.forward hot path).
# --------------------------------------------------------------------------- #
def downstream_expert_forward(features_padded, labels_onehot, wc, bc, wm, bm,
                              *, denom_t=None, time_tile_groups=None,
                              batch_tile=None, num_splits=None):
    """features_padded: (B, T, U); labels_onehot: (B, C) f32.

    Returns (logits (B, C) f32, loss scalar f32).
    """
    B, T, U = features_padded.shape
    D = wc.shape[1]
    C = wm.shape[1]
    itemsize = jnp.dtype(features_padded.dtype).itemsize
    vmem_limit, feat_budget = _vmem_limits()

    # ---- Lane packing (free reshape, no HBM copy) --------------------------- #
    # TODO(synk): when T % (128//U) != 0 we fall back to the unpacked layout;
    # the proper fix is upstream (round the pad_sequence target length up to a
    # multiple of 128//U, which is free at data-prep time).
    if U < 128 and 128 % U == 0 and T % (128 // U) == 0:
        k = 128 // U
    else:
        k = 1
    Tp = T // k
    P = k * U
    feats = features_padded.reshape(B, Tp, P) if k > 1 else features_padded

    # ---- Tiling ------------------------------------------------------------- #
    Bt = batch_tile if batch_tile is not None else _pick_batch_tile(B)
    assert B % Bt == 0 and (Bt == B or Bt % 8 == 0)
    TTg = (time_tile_groups if time_tile_groups is not None
           else _pick_time_tile_groups(Bt, Tp, P, itemsize, feat_budget))
    assert TTg == Tp or TTg % 8 == 0
    nT = -(-Tp // TTg)                                    # time blocks (last may be ragged)
    nB = B // Bt
    S = num_splits if num_splits is not None else (2 if (nB < 2 and nT >= 2) else 1)
    bps = -(-nT // S)                                     # time blocks per split

    grid = (S, nB, bps)
    kernel = functools.partial(_time_sum_kernel, tt=TTg, total_groups=Tp,
                               blocks_per_split=bps)

    # ---- Kernel 1: HBM-bandwidth-bound streaming time sum ------------------- #
    feat_sum = pl.pallas_call(
        kernel,
        out_shape=jax.ShapeDtypeStruct((S, B, P), jnp.float32),
        grid_spec=pltpu.PrefetchScalarGridSpec(
            num_scalar_prefetch=0,
            grid=grid,
            in_specs=[pl.BlockSpec(
                (Bt, TTg, P),
                lambda s, b, t: (b, jnp.minimum(s * bps + t, nT - 1), 0))],
            out_specs=pl.BlockSpec((1, Bt, P), lambda s, b, t: (s, b, 0)),
        ),
        compiler_params=pltpu.CompilerParams(
            dimension_semantics=("parallel", "parallel", "arbitrary"),
            vmem_limit_bytes=vmem_limit),
    )(feats)

    # ---- Kernel 2: tiny head (fold + connector + classifier + CE) ----------- #
    denom = float(denom_t) if denom_t is not None else float(T)
    logits, loss = pl.pallas_call(
        functools.partial(_head_kernel, 1.0 / denom, k),
        out_shape=(
            jax.ShapeDtypeStruct((B, C), jnp.float32),
            jax.ShapeDtypeStruct((1, 1), jnp.float32),
        ),
        grid_spec=pltpu.PrefetchScalarGridSpec(
            num_scalar_prefetch=0,
            grid=(1,),
            in_specs=[
                pl.BlockSpec((S, B, P), lambda i: (0, 0, 0)),  # split/packed partial sums
                pl.BlockSpec((U, D), lambda i: (0, 0)),        # connector W
                pl.BlockSpec((1, D), lambda i: (0, 0)),        # connector b
                pl.BlockSpec((D, C), lambda i: (0, 0)),        # classifier W
                pl.BlockSpec((1, C), lambda i: (0, 0)),        # classifier b
                pl.BlockSpec((B, C), lambda i: (0, 0)),        # one-hot labels
            ],
            out_specs=[
                pl.BlockSpec((B, C), lambda i: (0, 0)),        # logits
                pl.BlockSpec((1, 1), lambda i: (0, 0)),        # CE loss
            ],
        ),
        compiler_params=pltpu.CompilerParams(
            dimension_semantics=("arbitrary",)),
    )(feat_sum, wc, bc, wm, bm, labels_onehot)

    return logits, loss[0, 0]


# --------------------------------------------------------------------------- #
# Pure-JAX reference of the same forward pass.
# --------------------------------------------------------------------------- #
def _reference(features_padded, labels, wc, bc, wm, bm):
    h = features_padded @ wc + bc[0]            # (B, T, D)
    pooled = h.mean(axis=1)                     # mean over padded T, as in torch
    logits = pooled @ wm + bm[0]                # (B, C)
    logz = jax.nn.logsumexp(logits, axis=-1)
    loss = jnp.mean(logz - jnp.take_along_axis(logits, labels[:, None], axis=-1)[:, 0])
    return logits, loss


def _make_case(key, B, T, U, D, C, lengths):
    ks = jax.random.split(key, 5 + B)
    # Variable-length upstream features, then pad_sequence-equivalent zero pad.
    # TODO(synk): dataloading / pad_sequence of a ragged python list, records
    # and Tensorboard logging are host-side glue and stay outside the kernel.
    feats = jnp.zeros((B, T, U), jnp.float32)
    for i, L in enumerate(lengths):
        feats = feats.at[i, :L].set(jax.random.normal(ks[5 + i], (L, U), jnp.float32))
    wc = jax.random.normal(ks[0], (U, D), jnp.float32) / math.sqrt(U)
    bc = jax.random.normal(ks[1], (1, D), jnp.float32) * 0.01
    wm = jax.random.normal(ks[2], (D, C), jnp.float32) / math.sqrt(D)
    bm = jax.random.normal(ks[3], (1, C), jnp.float32) * 0.01
    labels = jax.random.randint(ks[4], (B,), 0, C, dtype=jnp.int32)
    return feats, wc, bc, wm, bm, labels


if __name__ == "__main__":
    # upstream_dim (U) = 32, modelrc input_dim (D) = 32, num_class (C) = 7 (label7 + 3)
    U, D, C = 32, 32, 7
    key = jax.random.PRNGKey(0)
    k1, k2, k3 = jax.random.split(key, 3)

    cases = [
        # (key, B, T, lengths, overrides)
        (k1, 2, 16, [16, 12], {}),                              # packed, single block
        (k2, 2, 88, [88, 60], {"time_tile_groups": 8}),         # packed, masked tail, 2 splits
        (k3, 2, 50, [50, 37], {"time_tile_groups": 8}),         # unpacked fallback, masked tail
    ]

    for ck, B, T, lengths, overrides in cases:
        feats, wc, bc, wm, bm, labels = _make_case(ck, B, T, U, D, C, lengths)
        labels_onehot = jax.nn.one_hot(labels, C, dtype=jnp.float32)

        logits, loss = downstream_expert_forward(
            feats, labels_onehot, wc, bc, wm, bm, **overrides)
        logits, loss = jax.block_until_ready((logits, loss))

        # records['acc'] equivalent (host-side glue, not hot path)
        predicted_classid = jnp.argmax(logits, axis=-1)
        acc = (predicted_classid == labels).astype(jnp.float32)
        _ = acc

        ref_logits, ref_loss = _reference(feats, labels, wc, bc, wm, bm)
        assert jnp.allclose(logits, ref_logits, atol=1e-3, rtol=1e-3), \
            f"logits mismatch (B={B}, T={T})"
        assert jnp.allclose(loss, ref_loss, atol=1e-4, rtol=1e-3), \
            f"loss mismatch (B={B}, T={T})"

    print("KERNEL_OK")
</pallas_src>

<mosaic_0001>
module attributes {stable_mosaic.version = 11 : i64} {
  func.func @_time_sum_kernel(%arg0: i32, %arg1: i32, %arg2: i32, %arg3: memref<2x4x128xf32, #tpu.memory_space<vmem>>, %arg4: memref<1x2x128xf32, #tpu.memory_space<vmem>>) attributes {dimension_semantics = [#tpu.dimension_semantics<parallel>, #tpu.dimension_semantics<parallel>, #tpu.dimension_semantics<arbitrary>], iteration_bounds = array<i64: 1, 1, 1>, scalar_prefetch = 0 : i64, scratch_operands = 0 : i64, tpu.core_type = #tpu.core_type<tc>, window_params = [{transform_indices = @transform_0, window_bounds = array<i64: 2, 4, 128>}, {transform_indices = @transform_1, window_bounds = array<i64: 1, 2, 128>}]} {
    %c0_i32 = arith.constant 0 : i32
    %0 = arith.cmpi eq, %arg2, %c0_i32 : i32
    %1 = arith.extui %0 : i1 to i32
    %c0_i32_0 = arith.constant 0 : i32
    %2 = arith.cmpi ne, %1, %c0_i32_0 : i32
    scf.if %2 {
      %cst = arith.constant 0.000000e+00 : f32
      %14 = vector.broadcast %cst : f32 to vector<1x2x128xf32>
      %c0_8 = arith.constant 0 : index
      %c0_9 = arith.constant 0 : index
      %c0_10 = arith.constant 0 : index
      %15 = vector.load %arg4[%c0_8, %c0_9, %c0_10] : memref<1x2x128xf32, #tpu.memory_space<vmem>>, vector<1x2x128xf32>
      tpu.vector_store %arg4[%c0_8, %c0_9, %c0_10], %14 {strides = array<i32>} : memref<1x2x128xf32, #tpu.memory_space<vmem>>, vector<1x2x128xf32>,
    } else {
    }
    %c1_i32 = arith.constant 1 : i32
    %3 = arith.muli %arg0, %c1_i32 : i32
    %4 = arith.addi %3, %arg2 : i32
    %c4_i32 = arith.constant 4 : i32
    %5 = arith.muli %4, %c4_i32 : i32
    %c4_i32_1 = arith.constant 4 : i32
    %6 = arith.subi %c4_i32_1, %5 : i32
    %c0 = arith.constant 0 : index
    %c0_2 = arith.constant 0 : index
    %c0_3 = arith.constant 0 : index
    %7 = vector.load %arg3[%c0, %c0_2, %c0_3] : memref<2x4x128xf32, #tpu.memory_space<vmem>>, vector<2x4x128xf32>
    %c4_i32_4 = arith.constant 4 : i32
    %8 = arith.cmpi sge, %6, %c4_i32_4 : i32
    %9 = arith.extui %8 : i1 to i32
    %c0_i32_5 = arith.constant 0 : i32
    %10 = arith.cmpi ne, %9, %c0_i32_5 : i32
    scf.if %10 {
      %c0_8 = arith.constant 0 : index
      %c0_9 = arith.constant 0 : index
      %c0_10 = arith.constant 0 : index
      %14 = vector.load %arg4[%c0_8, %c0_9, %c0_10] : memref<1x2x128xf32, #tpu.memory_space<vmem>>, vector<1x2x128xf32>
      %cst = arith.constant dense<0.000000e+00> : vector<2x128xf32>
      %15 = vector.multi_reduction <add>, %7, %cst [1] : vector<2x4x128xf32> to vector<2x128xf32>
      %16 = vector.shape_cast %15 : vector<2x128xf32> to vector<1x2x128xf32>
      %17 = arith.addf %14, %16 : vector<1x2x128xf32>
      %c0_11 = arith.constant 0 : index
      %c0_12 = arith.constant 0 : index
      %c0_13 = arith.constant 0 : index
      %18 = vector.load %arg4[%c0_11, %c0_12, %c0_13] : memref<1x2x128xf32, #tpu.memory_space<vmem>>, vector<1x2x128xf32>
      tpu.vector_store %arg4[%c0_11, %c0_12, %c0_13], %17 {strides = array<i32>} : memref<1x2x128xf32, #tpu.memory_space<vmem>>, vector<1x2x128xf32>,
    } else {
    }
    %c4_i32_6 = arith.constant 4 : i32
    %11 = arith.cmpi slt, %6, %c4_i32_6 : i32
    %12 = arith.extui %11 : i1 to i32
    %c0_i32_7 = arith.constant 0 : i32
    %13 = arith.cmpi ne, %12, %c0_i32_7 : i32
    scf.if %13 {
      %14 = tpu.iota {dimensions = array<i32: 1>} : vector<2x4x128xi32>
      %c0_8 = arith.constant 0 : index
      %c0_9 = arith.constant 0 : index
      %c0_10 = arith.constant 0 : index
      %15 = vector.load %arg4[%c0_8, %c0_9, %c0_10] : memref<1x2x128xf32, #tpu.memory_space<vmem>>, vector<1x2x128xf32>
      %16 = vector.broadcast %6 : i32 to vector<2x4x128xi32>
      %17 = arith.cmpi slt, %14, %16 : vector<2x4x128xi32>
      %cst = arith.constant 0.000000e+00 : f32
      %18 = vector.broadcast %cst : f32 to vector<2x4x128xf32>
      %19 = arith.select %17, %7, %18 : vector<2x4x128xi1>, vector<2x4x128xf32>
      %cst_11 = arith.constant dense<0.000000e+00> : vector<2x128xf32>
      %20 = vector.multi_reduction <add>, %19, %cst_11 [1] : vector<2x4x128xf32> to vector<2x128xf32>
      %21 = vector.shape_cast %20 : vector<2x128xf32> to vector<1x2x128xf32>
      %22 = arith.addf %15, %21 : vector<1x2x128xf32>
      %c0_12 = arith.constant 0 : index
      %c0_13 = arith.constant 0 : index
      %c0_14 = arith.constant 0 : index
      %23 = vector.load %arg4[%c0_12, %c0_13, %c0_14] : memref<1x2x128xf32, #tpu.memory_space<vmem>>, vector<1x2x128xf32>
      tpu.vector_store %arg4[%c0_12, %c0_13, %c0_14], %22 {strides = array<i32>} : memref<1x2x128xf32, #tpu.memory_space<vmem>>, vector<1x2x128xf32>,
    } else {
    }
    return
  }
  func.func @transform_0(%arg0: i32, %arg1: i32, %arg2: i32) -> (i32, i32, i32) {
    %c1_i32 = arith.constant 1 : i32
    %0 = arith.muli %arg0, %c1_i32 : i32
    %1 = arith.addi %0, %arg2 : i32
    %c0_i32 = arith.constant 0 : i32
    %2 = arith.minsi %1, %c0_i32 : i32
    %c0_i32_0 = arith.constant 0 : i32
    %c0_i32_1 = arith.constant 0 : i32
    return %arg1, %2, %c0_i32_0 : i32, i32, i32
  }
  func.func @transform_1(%arg0: i32, %arg1: i32, %arg2: i32) -> (i32, i32, i32) {
    %c0_i32 = arith.constant 0 : i32
    %c0_i32_0 = arith.constant 0 : i32
    return %arg0, %arg1, %c0_i32 : i32, i32, i32
  }
}

</mosaic_0001>

<bundles_post_ra>
// kernel: tpu_custom_call.1
= control target key start
LH: loop header
LB: loop body
LE: loop exit
PB: predicated region body
PF: predicated region fallthrough
CT: control target
= control target key end

     0   :  { %6 = vsyncpa [#allocation3], 0  ;;  %s188_s0 = inlined_call_operand.hbm [shape: f32[2,4,128], index: 0, kind: input, shape index: {}]   ;;  %s189_s1 = inlined_call_operand.hbm [shape: f32[1,2,128], index: 1, kind: output, shape index: {}]  }
   0x1   :  { %7 = vsyncpa [#allocation4], 0  ;;  %s167_s6 = smov [#allocation2]  }
   0x2   :  { %s18_s7 = sshll.u32 %s167_s6, 4  ;;  %s19_s7 = int_to_ptr.vmem [resolvable:$true] %s18_s7 }
   0x3   :  { %s131_s8 = scalar_lea.vmem %s19_s7, 128  ;;  %p136_p1 = scmp.lt.s32.totalorder %s19_s7, %s19_s7 }
   0x4   :  { %p132_p0 = scmp.ne.s32.totalorder %s19_s7, %s131_s8  ;;  %p137_p2 = scmp.lt.s32.totalorder %s131_s8, %s131_s8 }
   0x6   :  { %p138_p3 = por %p137_p2, %p136_p1 }
   0x8   :  { %p139_p4 = pnand %p138_p3, %p132_p0 }
   0xa   :  { %142 = shalt.err (!%p139_p4)
}
   0xb   :  { %s168_s9 = smov 64   ;;  %s169_s10 = smov 4  }
   0xc   :  { %24 = dma.hbm_to_vmem [thread:$0]  %s188_s0, 128, %s19_s7, [#allocation3], %s168_s9, %s168_s9, %s169_s10  }
   0xd   :  { %163 = dma.done.wait [#allocation3], 128  }
   0xe   :  { %164 = vsyncadd [#allocation3], 4294967168  ;;  %v170_v0 = vmov 0.0   ;;  %vm46_vm0 = vcmask 1043456   ;;  %v39_v1 = vld [vmem:[#allocation2] sm:$0xf] }
   0xf   :  { %35 = vst [vmem:[#allocation5] sm:$0x3] %v170_v0  ;;  %v40_v2 = vld [vmem:[#allocation2 + $0x4] sm:$0xf]  ;;  %v47_v3 = vsel %vm46_vm0, %v39_v1, 0.0  ;;  %vm63_vm1 = vcmask 1041409  }
  0x10   :  { %v54_v4 = vsel %vm46_vm0, %v40_v2, 0.0  ;;  %v48_v5 = vrot.slane %v47_v3, 4  ;;  %s171_s0 = smov [#allocation5]  }
  0x11   :  { %v55_v6 = vrot.slane %v54_v4, 4  ;;  %s107_s13 = sshll.u32 %s171_s0, 4  ;;  %s108_s13 = int_to_ptr.vmem [resolvable:$true] %s107_s13 }
  0x12   :  { %v49_v7 = vadd.f32 %v48_v5, %v47_v3  ;;  %s143_s14 = scalar_lea.vmem %s108_s13, 32  ;;  %p148_p6 = scmp.lt.s32.totalorder %s108_s13, %s108_s13 }
  0x13   :  { %v56_v8 = vadd.f32 %v55_v6, %v54_v4  ;;  %p144_p5 = scmp.ne.s32.totalorder %s108_s13, %s143_s14  ;;  %p149_p7 = scmp.lt.s32.totalorder %s143_s14, %s143_s14 }
  0x14   :  { %v50_v9 = vrot.slane %v49_v7, 2 }
  0x15   :  { %v57_v10 = vrot.slane %v56_v8, 2  ;;  %p150_p8 = por %p149_p7, %p148_p6 }
  0x16   :  { %v51_v11 = vadd.f32 %v50_v9, %v49_v7  ;;  %v45_v15 = vld [vmem:[#allocation5] sm:$0x3] }
  0x17   :  { %v58_v12 = vadd.f32 %v57_v10, %v56_v8  ;;  %p151_p9 = pnand %p150_p8, %p144_p5 }
  0x18   :  { %v52_v13 = vrot.slane %v51_v11, 1 }
  0x19   :  { %v59_v14 = vrot.slane %v58_v12, 1 }
  0x1a   :  { %v53_v16 = vadd.f32 %v52_v13, %v51_v11 }
  0x1b   :  { %v60_v17 = vadd.f32 %v59_v14, %v58_v12 }
  0x1d   :  { %v64_v18 = vsel %vm63_vm1, %v60_v17, %v53_v16 }
  0x1e   :  { %v66_v19 = vadd.f32 %v64_v18, %v45_v15 }
  0x20   :  { %67 = vst [vmem:[#allocation5] sm:$0x3] %v66_v19 }
  0x21   :  { %154 = shalt.err (!%p151_p9)
}
  0x22   :  { %110 = dma.vmem_to_hbm [thread:$0]  %s108_s13, 32, %s189_s1, [#allocation4]  }
  0x23   :  { %165 = dma.done.wait [#allocation4], 32  }
  0x24   :  { %166 = vsyncadd [#allocation4], 4294967264 }
  0x25   :  { %114 = vsyncpa [#allocation3], 1 }
  0x26   :  { %115 = vsyncpa [#allocation4], 1 }

</bundles_post_ra>
